<compile_context>
chip_gen: v6e
topology: v6e:2x2x1
jax: 0.10.0
libtpu: 0.0.40
codegen_flags: <defaults>
</compile_context>

<pallas_src>
import jax
import jax.numpy as jnp
from jax.experimental import pallas as pl
from jax.experimental.pallas import tpu as pltpu

LANE = 128


def _round_up(v, m):
    return (v + m - 1) // m * m


def _pad_to(x, rows, cols):
    return jnp.pad(x, ((0, rows - x.shape[0]), (0, cols - x.shape[1])))


# ---------------------------------------------------------------------------
# kernels
# ---------------------------------------------------------------------------
def _aggregate_step(a_ref, x_ref, w_ref, b_ref, acc_ref):
    """One K step of  acc += A[i,k] @ (X[k] @ W + b).

    AMPConv applies its Linear (weight AND bias) before message aggregation, so the
    bias is added to the per-K-tile X@W product (cheap VPU add next to two MXU dots).
    Both dots run on the MXU in bf16 with f32 accumulation.
    """
    @pl.when(pl.program_id(1) == 0)
    def _():
        acc_ref[...] = jnp.zeros_like(acc_ref)

    xw = jnp.dot(x_ref[...], w_ref[...], preferred_element_type=jnp.float32) + b_ref[...]
    acc_ref[...] += jnp.dot(a_ref[...], xw.astype(jnp.bfloat16),
                            preferred_element_type=jnp.float32)


def amp_conv1_kernel(a_ref, x_ref, w_ref, b_ref,
                     wd1_ref, bd1_ref, wd2_ref, bd2_ref, out_ref, acc_ref):
    """conv1: m = A_hat @ lin(x); out = relu( Lin2(relu(Lin1(m))) )  (denoiser MLP + AMPNet relu)."""
    _aggregate_step(a_ref, x_ref, w_ref, b_ref, acc_ref)

    @pl.when(pl.program_id(1) == pl.num_programs(1) - 1)
    def _():
        # fresh state: onsager == 0, prev_out is None, memory == 0  ->  out_d == m
        m = acc_ref[...]
        d = jnp.dot(m.astype(jnp.bfloat16), wd1_ref[...],
                    preferred_element_type=jnp.float32) + bd1_ref[...]
        d = jnp.maximum(d, 0.0)
        d = jnp.dot(d.astype(jnp.bfloat16), wd2_ref[...],
                    preferred_element_type=jnp.float32) + bd2_ref[...]
        # AMPNet: F.relu(conv1(...)) then F.dropout(p=0.5, training=False) == identity.
        out_ref[...] = jnp.maximum(d, 0.0).astype(out_ref.dtype)


def make_amp_conv2_kernel(num_classes):
    """conv2: m = A_hat @ lin(h); denoiser = ReLU; then masked log_softmax over real classes."""
    def kernel(a_ref, x_ref, w_ref, b_ref, out_ref, acc_ref):
        _aggregate_step(a_ref, x_ref, w_ref, b_ref, acc_ref)

        @pl.when(pl.program_id(1) == pl.num_programs(1) - 1)
        def _():
            o = jnp.maximum(acc_ref[...], 0.0)                       # denoiser = ReLU
            col = jax.lax.broadcasted_iota(jnp.int32, o.shape, 1)    # mask lane padding
            o = jnp.where(col < num_classes, o, -1e30)
            mx = jnp.max(o, axis=-1, keepdims=True)
            z = o - mx
            lse = jnp.log(jnp.sum(jnp.exp(z), axis=-1, keepdims=True))
            out_ref[...] = (z - lse).astype(out_ref.dtype)
    return kernel


# ---------------------------------------------------------------------------
# wrapper
# ---------------------------------------------------------------------------
def amp_net_forward(a_hat, x, params, *, tm=128, tk=128):
    """Fresh-state eval forward of AMPNet (agg='add', lamp=False, use_skip=False, memory=0)."""
    (w1, b1, wd1, bd1, wd2, bd2, w2, b2) = params
    n, in_dim = x.shape
    hid = w1.shape[1]
    out_dim = w2.shape[1]

    n_pad = _round_up(n, max(tm, tk))
    in_dim_pad = _round_up(in_dim, LANE)
    hid_pad = _round_up(hid, LANE)
    out_dim_pad = _round_up(out_dim, LANE)

    # bf16 MXU operands (zero-padded), f32 biases / accumulation / epilogue.
    a_p = _pad_to(a_hat, n_pad, n_pad).astype(jnp.bfloat16)
    x_p = _pad_to(x, n_pad, in_dim_pad).astype(jnp.bfloat16)
    w1_p = _pad_to(w1, in_dim_pad, hid_pad).astype(jnp.bfloat16)
    b1_p = _pad_to(b1, 1, hid_pad)
    wd1_p = _pad_to(wd1, hid_pad, hid_pad).astype(jnp.bfloat16)
    bd1_p = _pad_to(bd1, 1, hid_pad)
    wd2_p = _pad_to(wd2, hid_pad, hid_pad).astype(jnp.bfloat16)
    bd2_p = _pad_to(bd2, 1, hid_pad)
    w2_p = _pad_to(w2, hid_pad, out_dim_pad).astype(jnp.bfloat16)
    b2_p = _pad_to(b2, 1, out_dim_pad)

    grid = (n_pad // tm, n_pad // tk)
    cparams = pltpu.CompilerParams(
        dimension_semantics=("parallel", "arbitrary"))   # row tiles parallel (v7x 2 TCs)

    def full_spec(r, c):
        return pl.BlockSpec((r, c), lambda i, k: (0, 0))

    a_spec = pl.BlockSpec((tm, tk), lambda i, k: (i, k))

    # ---- layer 1: conv1 + denoiser MLP + AMPNet ReLU ----
    h_pad = pl.pallas_call(
        amp_conv1_kernel,
        out_shape=jax.ShapeDtypeStruct((n_pad, hid_pad), jnp.bfloat16),
        grid_spec=pltpu.PrefetchScalarGridSpec(
            num_scalar_prefetch=0, grid=grid,
            in_specs=[a_spec,
                      pl.BlockSpec((tk, in_dim_pad), lambda i, k: (k, 0)),
                      full_spec(in_dim_pad, hid_pad), full_spec(1, hid_pad),
                      full_spec(hid_pad, hid_pad), full_spec(1, hid_pad),
                      full_spec(hid_pad, hid_pad), full_spec(1, hid_pad)],
            out_specs=pl.BlockSpec((tm, hid_pad), lambda i, k: (i, 0)),
            scratch_shapes=[pltpu.VMEM((tm, hid_pad), jnp.float32)]),
        compiler_params=cparams,
    )(a_p, x_p, w1_p, b1_p, wd1_p, bd1_p, wd2_p, bd2_p)

    # ---- layer 2: conv2 (ReLU denoiser) + log_softmax ----
    logp_pad = pl.pallas_call(
        make_amp_conv2_kernel(out_dim),
        out_shape=jax.ShapeDtypeStruct((n_pad, out_dim_pad), jnp.float32),
        grid_spec=pltpu.PrefetchScalarGridSpec(
            num_scalar_prefetch=0, grid=grid,
            in_specs=[a_spec,
                      pl.BlockSpec((tk, hid_pad), lambda i, k: (k, 0)),
                      full_spec(hid_pad, out_dim_pad), full_spec(1, out_dim_pad)],
            out_specs=pl.BlockSpec((tm, out_dim_pad), lambda i, k: (i, 0)),
            scratch_shapes=[pltpu.VMEM((tm, out_dim_pad), jnp.float32)]),
        compiler_params=cparams,
    )(a_p, h_pad, w2_p, b2_p)

    return logp_pad[:n, :out_dim]


# ---------------------------------------------------------------------------
# graph preprocessing + pure-JAX reference
# ---------------------------------------------------------------------------
def build_normalized_adjacency(edge_index, num_nodes):
    """Dense aggregation matrix matching AMPConv (agg='add'):

    add_self_loops appends one (v, v) edge per node unconditionally; duplicate edges and
    pre-existing self-loops each contribute (scatter-add, not set); deg = degree(row);
    messages gather from edge_index[0] (source) and aggregate into edge_index[1] (target):
        A[target, source] = count(source, target) * deg(target)^-1/2 * deg(source)^-1/2
    """
    row, col = edge_index[0], edge_index[1]
    counts = jnp.zeros((num_nodes, num_nodes), jnp.float32)
    counts = counts.at[row, col].add(1.0)
    counts = counts + jnp.eye(num_nodes, dtype=jnp.float32)   # unconditional self loops
    deg = jnp.sum(counts, axis=1)                             # == degree(row), >= 1
    dinv = jax.lax.rsqrt(deg)
    return dinv[:, None] * counts.T * dinv[None, :]


def reference_forward(a_hat, x, params):
    """Pure-JAX reference with the same bf16 operand / f32 accumulation policy."""
    (w1, b1, wd1, bd1, wd2, bd2, w2, b2) = params
    bf = jnp.bfloat16

    def mm(a, b):
        return jnp.dot(a.astype(bf), b.astype(bf), preferred_element_type=jnp.float32)

    # conv1 + denoiser MLP + AMPNet relu (dropout identity in eval)
    x_lin = mm(x, w1) + b1
    m1 = mm(a_hat, x_lin)
    d = jnp.maximum(mm(m1, wd1) + bd1, 0.0)
    d = mm(d, wd2) + bd2
    h = jnp.maximum(d, 0.0)
    # conv2 (ReLU denoiser) + log_softmax
    h_lin = mm(h, w2) + b2
    m2 = mm(a_hat, h_lin)
    o = jnp.maximum(m2, 0.0)
    return jax.nn.log_softmax(o, axis=-1)


# ---------------------------------------------------------------------------
if __name__ == "__main__":
    # small synthetic graph
    N, IN_DIM, HID_DIM, OUT_DIM, N_EDGES = 64, 16, 64, 8, 256

    key = jax.random.PRNGKey(0)
    ks = jax.random.split(key, 6)

    x = jax.random.normal(ks[0], (N, IN_DIM), jnp.float32)
    edge_index = jax.random.randint(ks[1], (2, N_EDGES), 0, N)
    a_hat = build_normalized_adjacency(edge_index, N)

    def lin_init(k, fan_in, fan_out):
        kw, kb = jax.random.split(k)
        lim = 1.0 / float(fan_in) ** 0.5
        w = jax.random.uniform(kw, (fan_in, fan_out), jnp.float32, -lim, lim)
        b = jax.random.uniform(kb, (1, fan_out), jnp.float32, -lim, lim)
        return w, b

    w1, b1 = lin_init(ks[2], IN_DIM, HID_DIM)       # conv1.lin
    wd1, bd1 = lin_init(ks[3], HID_DIM, HID_DIM)    # conv1.denoiser[0]
    wd2, bd2 = lin_init(ks[4], HID_DIM, HID_DIM)    # conv1.denoiser[2]
    w2, b2 = lin_init(ks[5], HID_DIM, OUT_DIM)      # conv2.lin
    params = (w1, b1, wd1, bd1, wd2, bd2, w2, b2)

    out = amp_net_forward(a_hat, x, params)
    out = jax.block_until_ready(out)

    ref = reference_forward(a_hat, x, params)
    assert out.shape == (N, OUT_DIM)
    assert bool(jnp.all(jnp.isfinite(out)))
    assert jnp.allclose(out, ref, atol=1e-3, rtol=1e-3), "mismatch vs JAX reference"

    print("KERNEL_OK")
</pallas_src>

<mosaic_0001>
module attributes {stable_mosaic.version = 11 : i64} {
  func.func @amp_conv1_kernel(%arg0: i32, %arg1: i32, %arg2: memref<128x128xbf16, #tpu.memory_space<vmem>>, %arg3: memref<128x128xbf16, #tpu.memory_space<vmem>>, %arg4: memref<128x128xbf16, #tpu.memory_space<vmem>>, %arg5: memref<1x128xf32, #tpu.memory_space<vmem>>, %arg6: memref<128x128xbf16, #tpu.memory_space<vmem>>, %arg7: memref<1x128xf32, #tpu.memory_space<vmem>>, %arg8: memref<128x128xbf16, #tpu.memory_space<vmem>>, %arg9: memref<1x128xf32, #tpu.memory_space<vmem>>, %arg10: memref<128x128xbf16, #tpu.memory_space<vmem>>, %arg11: memref<128x128xf32, #tpu.memory_space<vmem>>) attributes {dimension_semantics = [#tpu.dimension_semantics<parallel>, #tpu.dimension_semantics<arbitrary>], iteration_bounds = array<i64: 1, 1>, scalar_prefetch = 0 : i64, scratch_operands = 1 : i64, tpu.core_type = #tpu.core_type<tc>, window_params = [{transform_indices = @transform_0, window_bounds = array<i64: 128, 128>}, {transform_indices = @transform_1, window_bounds = array<i64: 128, 128>}, {pipeline_mode = #tpu.pipeline_mode<synchronous>, transform_indices = @transform_2, window_bounds = array<i64: 128, 128>}, {pipeline_mode = #tpu.pipeline_mode<synchronous>, transform_indices = @transform_3, window_bounds = array<i64: 1, 128>}, {pipeline_mode = #tpu.pipeline_mode<synchronous>, transform_indices = @transform_4, window_bounds = array<i64: 128, 128>}, {pipeline_mode = #tpu.pipeline_mode<synchronous>, transform_indices = @transform_5, window_bounds = array<i64: 1, 128>}, {pipeline_mode = #tpu.pipeline_mode<synchronous>, transform_indices = @transform_6, window_bounds = array<i64: 128, 128>}, {pipeline_mode = #tpu.pipeline_mode<synchronous>, transform_indices = @transform_7, window_bounds = array<i64: 1, 128>}, {transform_indices = @transform_8, window_bounds = array<i64: 128, 128>}]} {
    %c0_i32 = arith.constant 0 : i32
    %0 = arith.cmpi eq, %arg1, %c0_i32 : i32
    %1 = arith.extui %0 : i1 to i32
    %c0_i32_0 = arith.constant 0 : i32
    %2 = arith.cmpi ne, %1, %c0_i32_0 : i32
    scf.if %2 {
      %cst_15 = arith.constant 0.000000e+00 : f32
      %18 = vector.broadcast %cst_15 : f32 to vector<128x128xf32>
      %c0_16 = arith.constant 0 : index
      %c0_17 = arith.constant 0 : index
      %19 = vector.load %arg11[%c0_16, %c0_17] : memref<128x128xf32, #tpu.memory_space<vmem>>, vector<128x128xf32>
      tpu.vector_store %arg11[%c0_16, %c0_17], %18 {strides = array<i32>} : memref<128x128xf32, #tpu.memory_space<vmem>>, vector<128x128xf32>,
    } else {
    }
    %c0 = arith.constant 0 : index
    %c0_1 = arith.constant 0 : index
    %3 = vector.load %arg3[%c0, %c0_1] : memref<128x128xbf16, #tpu.memory_space<vmem>>, vector<128x128xbf16>
    %c0_2 = arith.constant 0 : index
    %c0_3 = arith.constant 0 : index
    %4 = vector.load %arg4[%c0_2, %c0_3] : memref<128x128xbf16, #tpu.memory_space<vmem>>, vector<128x128xbf16>
    %cst = arith.constant dense<0.000000e+00> : vector<128x128xf32>
    %5 = tpu.matmul %3, %4, %cst {dimension_numbers = #tpu.dot_dimension_numbers<[1], [0], [0], [1], [0, 0, 1, 1], [], []>} : vector<128x128xbf16>, vector<128x128xbf16>, vector<128x128xf32> -> vector<128x128xf32>
    %c0_4 = arith.constant 0 : index
    %c0_5 = arith.constant 0 : index
    %6 = vector.load %arg5[%c0_4, %c0_5] : memref<1x128xf32, #tpu.memory_space<vmem>>, vector<1x128xf32>
    %7 = vector.broadcast %6 : vector<1x128xf32> to vector<128x128xf32>
    %8 = arith.addf %5, %7 : vector<128x128xf32>
    %c0_6 = arith.constant 0 : index
    %c0_7 = arith.constant 0 : index
    %9 = vector.load %arg11[%c0_6, %c0_7] : memref<128x128xf32, #tpu.memory_space<vmem>>, vector<128x128xf32>
    %c0_8 = arith.constant 0 : index
    %c0_9 = arith.constant 0 : index
    %10 = vector.load %arg2[%c0_8, %c0_9] : memref<128x128xbf16, #tpu.memory_space<vmem>>, vector<128x128xbf16>
    %11 = arith.truncf %8 : vector<128x128xf32> to vector<128x128xbf16>
    %cst_10 = arith.constant dense<0.000000e+00> : vector<128x128xf32>
    %12 = tpu.matmul %10, %11, %cst_10 {dimension_numbers = #tpu.dot_dimension_numbers<[1], [0], [0], [1], [0, 0, 1, 1], [], []>} : vector<128x128xbf16>, vector<128x128xbf16>, vector<128x128xf32> -> vector<128x128xf32>
    %13 = arith.addf %9, %12 : vector<128x128xf32>
    %c0_11 = arith.constant 0 : index
    %c0_12 = arith.constant 0 : index
    %14 = vector.load %arg11[%c0_11, %c0_12] : memref<128x128xf32, #tpu.memory_space<vmem>>, vector<128x128xf32>
    tpu.vector_store %arg11[%c0_11, %c0_12], %13 {strides = array<i32>} : memref<128x128xf32, #tpu.memory_space<vmem>>, vector<128x128xf32>,
    %c0_i32_13 = arith.constant 0 : i32
    %15 = arith.cmpi eq, %arg1, %c0_i32_13 : i32
    %16 = arith.extui %15 : i1 to i32
    %c0_i32_14 = arith.constant 0 : i32
    %17 = arith.cmpi ne, %16, %c0_i32_14 : i32
    scf.if %17 {
      %c0_15 = arith.constant 0 : index
      %c0_16 = arith.constant 0 : index
      %18 = vector.load %arg11[%c0_15, %c0_16] : memref<128x128xf32, #tpu.memory_space<vmem>>, vector<128x128xf32>
      %19 = arith.truncf %18 : vector<128x128xf32> to vector<128x128xbf16>
      %c0_17 = arith.constant 0 : index
      %c0_18 = arith.constant 0 : index
      %20 = vector.load %arg6[%c0_17, %c0_18] : memref<128x128xbf16, #tpu.memory_space<vmem>>, vector<128x128xbf16>
      %cst_19 = arith.constant dense<0.000000e+00> : vector<128x128xf32>
      %21 = tpu.matmul %19, %20, %cst_19 {dimension_numbers = #tpu.dot_dimension_numbers<[1], [0], [0], [1], [0, 0, 1, 1], [], []>} : vector<128x128xbf16>, vector<128x128xbf16>, vector<128x128xf32> -> vector<128x128xf32>
      %c0_20 = arith.constant 0 : index
      %c0_21 = arith.constant 0 : index
      %22 = vector.load %arg7[%c0_20, %c0_21] : memref<1x128xf32, #tpu.memory_space<vmem>>, vector<1x128xf32>
      %23 = vector.broadcast %22 : vector<1x128xf32> to vector<128x128xf32>
      %24 = arith.addf %21, %23 : vector<128x128xf32>
      %cst_22 = arith.constant 0.000000e+00 : f32
      %25 = vector.broadcast %cst_22 : f32 to vector<128x128xf32>
      %26 = arith.maximumf %24, %25 : vector<128x128xf32>
      %27 = arith.truncf %26 : vector<128x128xf32> to vector<128x128xbf16>
      %c0_23 = arith.constant 0 : index
      %c0_24 = arith.constant 0 : index
      %28 = vector.load %arg8[%c0_23, %c0_24] : memref<128x128xbf16, #tpu.memory_space<vmem>>, vector<128x128xbf16>
      %cst_25 = arith.constant dense<0.000000e+00> : vector<128x128xf32>
      %29 = tpu.matmul %27, %28, %cst_25 {dimension_numbers = #tpu.dot_dimension_numbers<[1], [0], [0], [1], [0, 0, 1, 1], [], []>} : vector<128x128xbf16>, vector<128x128xbf16>, vector<128x128xf32> -> vector<128x128xf32>
      %c0_26 = arith.constant 0 : index
      %c0_27 = arith.constant 0 : index
      %30 = vector.load %arg9[%c0_26, %c0_27] : memref<1x128xf32, #tpu.memory_space<vmem>>, vector<1x128xf32>
      %31 = vector.broadcast %30 : vector<1x128xf32> to vector<128x128xf32>
      %32 = arith.addf %29, %31 : vector<128x128xf32>
      %cst_28 = arith.constant 0.000000e+00 : f32
      %33 = vector.broadcast %cst_28 : f32 to vector<128x128xf32>
      %34 = arith.maximumf %32, %33 : vector<128x128xf32>
      %35 = arith.truncf %34 : vector<128x128xf32> to vector<128x128xbf16>
      %c0_29 = arith.constant 0 : index
      %c0_30 = arith.constant 0 : index
      %36 = vector.load %arg10[%c0_29, %c0_30] : memref<128x128xbf16, #tpu.memory_space<vmem>>, vector<128x128xbf16>
      tpu.vector_store %arg10[%c0_29, %c0_30], %35 {strides = array<i32>} : memref<128x128xbf16, #tpu.memory_space<vmem>>, vector<128x128xbf16>,
    } else {
    }
    return
  }
  func.func @transform_0(%arg0: i32, %arg1: i32) -> (i32, i32) {
    %c0_i32 = arith.constant 0 : i32
    return %arg0, %arg1 : i32, i32
  }
  func.func @transform_1(%arg0: i32, %arg1: i32) -> (i32, i32) {
    %c0_i32 = arith.constant 0 : i32
    %c0_i32_0 = arith.constant 0 : i32
    return %arg1, %c0_i32 : i32, i32
  }
  func.func @transform_2(%arg0: i32, %arg1: i32) -> (i32, i32) {
    %c0_i32 = arith.constant 0 : i32
    %c0_i32_0 = arith.constant 0 : i32
    %c0_i32_1 = arith.constant 0 : i32
    return %c0_i32, %c0_i32_0 : i32, i32
  }
  func.func @transform_3(%arg0: i32, %arg1: i32) -> (i32, i32) {
    %c0_i32 = arith.constant 0 : i32
    %c0_i32_0 = arith.constant 0 : i32
    %c0_i32_1 = arith.constant 0 : i32
    return %c0_i32, %c0_i32_0 : i32, i32
  }
  func.func @transform_4(%arg0: i32, %arg1: i32) -> (i32, i32) {
    %c0_i32 = arith.constant 0 : i32
    %c0_i32_0 = arith.constant 0 : i32
    %c0_i32_1 = arith.constant 0 : i32
    return %c0_i32, %c0_i32_0 : i32, i32
  }
  func.func @transform_5(%arg0: i32, %arg1: i32) -> (i32, i32) {
    %c0_i32 = arith.constant 0 : i32
    %c0_i32_0 = arith.constant 0 : i32
    %c0_i32_1 = arith.constant 0 : i32
    return %c0_i32, %c0_i32_0 : i32, i32
  }
  func.func @transform_6(%arg0: i32, %arg1: i32) -> (i32, i32) {
    %c0_i32 = arith.constant 0 : i32
    %c0_i32_0 = arith.constant 0 : i32
    %c0_i32_1 = arith.constant 0 : i32
    return %c0_i32, %c0_i32_0 : i32, i32
  }
  func.func @transform_7(%arg0: i32, %arg1: i32) -> (i32, i32) {
    %c0_i32 = arith.constant 0 : i32
    %c0_i32_0 = arith.constant 0 : i32
    %c0_i32_1 = arith.constant 0 : i32
    return %c0_i32, %c0_i32_0 : i32, i32
  }
  func.func @transform_8(%arg0: i32, %arg1: i32) -> (i32, i32) {
    %c0_i32 = arith.constant 0 : i32
    %c0_i32_0 = arith.constant 0 : i32
    return %arg0, %c0_i32 : i32, i32
  }
}

</mosaic_0001>

<bundles_post_ra>
// kernel: tpu_custom_call.1
= control target key start
LH: loop header
LB: loop body
LE: loop exit
PB: predicated region body
PF: predicated region fallthrough
CT: control target
= control target key end

     0   :  { %13 = vsyncpa [#allocation4], 0  ;;  %s1658_s0 = inlined_call_operand.hbm [shape: bf16[128,128], index: 0, kind: input, shape index: {}]   ;;  %s1659_s1 = inlined_call_operand.hbm [shape: bf16[128,128], index: 1, kind: input, shape index: {}]   ;;  %s1660_s2 = inlined_call_operand.hbm [shape: bf16[128,128], index: 2, kind: input, shape index: {}]   ;;  %s1661_s3 = inlined_call_operand.vmem [shape: f32[1,128], index: 3, kind: input, shape index: {}]   ;;  %s1662_s4 = inlined_call_operand.hbm [shape: bf16[128,128], index: 4, kind: input, shape index: {}]   ;;  %s1663_s5 = inlined_call_operand.vmem [shape: f32[1,128], index: 5, kind: input, shape index: {}]   ;;  %s1664_s6 = inlined_call_operand.hbm [shape: bf16[128,128], index: 6, kind: input, shape index: {}]   ;;  %s1665_s7 = inlined_call_operand.vmem [shape: f32[1,128], index: 7, kind: input, shape index: {}]   ;;  %s1666_s8 = inlined_call_operand.hbm [shape: bf16[128,128], index: 8, kind: output, shape index: {}]  }
   0x1   :  { %14 = vsyncpa [#allocation7], 0 }
   0x2   :  { %15 = vsyncpa [#allocation10], 0 }
   0x3   :  { %16 = vsyncpa [#allocation5], 0  ;;  %s1560_s27 = smov [#allocation6]   ;;  %s1561_s29 = smov [#allocation9]  }
   0x4   :  { %s34_s28 = sshll.u32 %s1560_s27, 4  ;;  %s60_s30 = sshll.u32 %s1561_s29, 4  ;;  %s35_s28 = int_to_ptr.vmem [resolvable:$true] %s34_s28  ;;  %s61_s30 = int_to_ptr.vmem [resolvable:$true] %s60_s30 }
   0x5   :  { %s1440_s9 = scalar_lea.vmem %s35_s28, 1024  ;;  %p1445_p1 = scmp.lt.s32.totalorder %s35_s28, %s35_s28 }
   0x6   :  { %p1441_p0 = scmp.ne.s32.totalorder %s35_s28, %s1440_s9  ;;  %p1446_p2 = scmp.lt.s32.totalorder %s1440_s9, %s1440_s9 }
   0x8   :  { %p1447_p3 = por %p1446_p2, %p1445_p1 }
   0xa   :  { %p1448_p4 = pnand %p1447_p3, %p1441_p0 }
   0xc   :  { %1451 = shalt.err (!%p1448_p4)
}
   0xd   :  { %s1562_s10 = smov 64   ;;  %s1563_s11 = smov 4  }
   0xe   :  { %40 = dma.hbm_to_vmem [thread:$0]  %s1659_s1, 1024, %s35_s28, [#allocation7], %s1562_s10, %s1562_s10, %s1563_s11  }
   0xf   :  { %s1460_s14 = scalar_lea.vmem %s61_s30, 1024  ;;  %p1465_p6 = scmp.lt.s32.totalorder %s61_s30, %s61_s30 }
  0x10   :  { %p1461_p5 = scmp.ne.s32.totalorder %s61_s30, %s1460_s14  ;;  %p1466_p7 = scmp.lt.s32.totalorder %s1460_s14, %s1460_s14 }
  0x12   :  { %p1467_p8 = por %p1466_p7, %p1465_p6 }
  0x14   :  { %p1468_p9 = pnand %p1467_p8, %p1461_p5 }
  0x16   :  { %1471 = shalt.err (!%p1468_p9)
}
  0x17   :  { %66 = dma.hbm_to_vmem [thread:$0]  %s1662_s4, 1024, %s61_s30, [#allocation10], %s1562_s10, %s1562_s10, %s1563_s11  }
  0x18   :  { %s1564_s17 = smov [#allocation3]   ;;  %s1565_s19 = smov [#allocation8]  }
  0x19   :  { %s22_s18 = sshll.u32 %s1564_s17, 4  ;;  %s46_s20 = sshll.u32 %s1565_s19, 4  ;;  %s23_s18 = int_to_ptr.vmem [resolvable:$true] %s22_s18  ;;  %s47_s20 = int_to_ptr.vmem [resolvable:$true] %s46_s20 }
  0x1a   :  { %s1480_s1 = scalar_lea.vmem %s23_s18, 1024  ;;  %p1485_p11 = scmp.lt.s32.totalorder %s23_s18, %s23_s18 }
  0x1b   :  { %p1481_p10 = scmp.ne.s32.totalorder %s23_s18, %s1480_s1  ;;  %p1486_p12 = scmp.lt.s32.totalorder %s1480_s1, %s1480_s1 }
  0x1d   :  { %p1487_p13 = por %p1486_p12, %p1485_p11 }
  0x1f   :  { %p1488_p0 = pnand %p1487_p13, %p1481_p10 }
  0x21   :  { %1491 = shalt.err (!%p1488_p0)
}
  0x22   :  { %28 = dma.hbm_to_vmem [thread:$0]  %s1658_s0, 1024, %s23_s18, [#allocation4], %s1562_s10, %s1562_s10, %s1563_s11  }
  0x23   :  { %s1500_s4 = scalar_lea.vmem %s47_s20, 1024  ;;  %p1505_p2 = scmp.lt.s32.totalorder %s47_s20, %s47_s20 }
  0x24   :  { %p1501_p1 = scmp.ne.s32.totalorder %s47_s20, %s1500_s4  ;;  %p1506_p3 = scmp.lt.s32.totalorder %s1500_s4, %s1500_s4 }
  0x26   :  { %p1507_p4 = por %p1506_p3, %p1505_p2 }
  0x28   :  { %p1508_p5 = pnand %p1507_p4, %p1501_p1 }
  0x2a   :  { %1511 = shalt.err (!%p1508_p5)
}
  0x2b   :  { %52 = dma.hbm_to_vmem [thread:$0]  %s1660_s2, 1024, %s47_s20, [#allocation7], %s1562_s10, %s1562_s10, %s1563_s11  }
  0x2c   :  { %s1566_s25 = smov [#allocation11]  }
  0x2d   :  { %s74_s26 = sshll.u32 %s1566_s25, 4  ;;  %s75_s26 = int_to_ptr.vmem [resolvable:$true] %s74_s26 }
  0x2e   :  { %s1520_s27 = scalar_lea.vmem %s75_s26, 1024  ;;  %p1525_p7 = scmp.lt.s32.totalorder %s75_s26, %s75_s26 }
  0x2f   :  { %p1521_p6 = scmp.ne.s32.totalorder %s75_s26, %s1520_s27  ;;  %p1526_p8 = scmp.lt.s32.totalorder %s1520_s27, %s1520_s27 }
  0x31   :  { %p1527_p9 = por %p1526_p8, %p1525_p7 }
  0x33   :  { %p1528_p10 = pnand %p1527_p9, %p1521_p6 }
  0x35   :  { %1531 = shalt.err (!%p1528_p10)
}
  0x36   :  { %80 = dma.hbm_to_vmem [thread:$0]  %s1664_s6, 1024, %s75_s26, [#allocation10], %s1562_s10, %s1562_s10, %s1563_s11  }
  0x37   :  { %1552 = dma.done.wait [#allocation4], 1024  }
  0x38   :  { %1553 = vsyncadd [#allocation4], 4294966272 }
  0x39   :  { %1554 = dma.done.wait [#allocation7], 2048  }
  0x3a   :  { %1555 = vsyncadd [#allocation7], 4294965248 }
  0x3b   :  { %1556 = dma.done.wait [#allocation10], 2048  }
  0x3c   :  { %1557 = vsyncadd [#allocation10], 4294965248  ;;  %v1392_v0 = vld [vmem:[#allocation8 + $0x38] sm:$0xff]   ;;  %v1393_v1 = vld [vmem:[#allocation8 + $0x30] sm:$0xff]  }
  0x3d   :  { %1256 = vmatprep.subr.bf16.mxu0 %v1392_v0  ;;  %v1394_v2 = vld [vmem:[#allocation8 + $0x28] sm:$0xff]   ;;  %v1395_v3 = vld [vmem:[#allocation8 + $0x20] sm:$0xff]   ;;  %v1396_v5 = vld [vmem:[#allocation8 + $0x18] sm:$0xff]  }
  0x3e   :  { %1257 = vmatpush3.bf16.msra.mxu0 %v1392_v0  ;;  %v1400_v4 = vld [vmem:[#allocation6] sm:$0xff]   ;;  %v1397_v6 = vld [vmem:[#allocation8 + $0x10] sm:$0xff]   ;;  %v1398_v7 = vld [vmem:[#allocation8 + $0x8] sm:$0xff]  }
  0x3f   :  { %1258 = vmatprep.subr.bf16.mxu0 %v1393_v1  ;;  %1272 = vmatprep.mubr.bf16.mxu0 %v1400_v4  ;;  %v1399_v8 = vld [vmem:[#allocation8] sm:$0xff]   ;;  %v1401_v9 = vld [vmem:[#allocation6 + $0x8] sm:$0xff]   ;;  %v1402_v10 = vld [vmem:[#allocation6 + $0x10] sm:$0xff]  }
  0x40   :  { %v1403_v11 = vld [vmem:[#allocation6 + $0x18] sm:$0xff]   ;;  %v1404_v12 = vld [vmem:[#allocation6 + $0x20] sm:$0xff]   ;;  %v1405_v13 = vld [vmem:[#allocation6 + $0x28] sm:$0xff]  }
  0x41   :  { %v1406_v14 = vld [vmem:[#allocation6 + $0x30] sm:$0xff]   ;;  %v1407_v15 = vld [vmem:[#allocation6 + $0x38] sm:$0xff]   ;;  %v1408_v16 = vld [vmem:[#allocation3] sm:$0xff]  }
  0x42   :  { %1259 = vmatpush3.bf16.msra.mxu0 %v1393_v1  ;;  %1304 = vmatprep.mubr.bf16.mxu1 %v1408_v16  ;;  %v1416_v17 = vld [vmem:[#allocation9 + $0x38] sm:$0xff]   ;;  %v1417_v18 = vld [vmem:[#allocation9 + $0x30] sm:$0xff]   ;;  %v1418_v19 = vld [vmem:[#allocation9 + $0x28] sm:$0xff]  }
  0x43   :  { %1260 = vmatprep.subr.bf16.mxu0 %v1394_v2  ;;  %v1419_v20 = vld [vmem:[#allocation9 + $0x20] sm:$0xff]   ;;  %v1420_v21 = vld [vmem:[#allocation9 + $0x18] sm:$0xff]   ;;  %v1421_v22 = vld [vmem:[#allocation9 + $0x10] sm:$0xff]  }
  0x44   :  { %v1070_v37 = vld [vmem:[%s1661_s3] ss:$0 sm:$0xff]  ;;  %v1409_v0 = vld [vmem:[#allocation3 + $0x8] sm:$0xff]   ;;  %v1410_v1 = vld [vmem:[#allocation3 + $0x10] sm:$0xff]  }
  0x45   :  { %v1413_v4 = vld [vmem:[#allocation3 + $0x28] sm:$0xff]  }
  0x46   :  { %1261 = vmatpush3.bf16.msra.mxu0 %v1394_v2  ;;  %v1411_v2 = vld [vmem:[#allocation3 + $0x18] sm:$0xff]  }
  0x47   :  { %1262 = vmatprep.subr.bf16.mxu0 %v1395_v3 }
  0x4a   :  { %1263 = vmatpush3.bf16.msra.mxu0 %v1395_v3  ;;  %v1412_v3 = vld [vmem:[#allocation3 + $0x20] sm:$0xff]  }
  0x4b   :  { %1264 = vmatprep.subr.bf16.mxu0 %v1396_v5 }
  0x4e   :  { %1265 = vmatpush3.bf16.msra.mxu0 %v1396_v5  ;;  %v1414_v5 = vld [vmem:[#allocation3 + $0x30] sm:$0xff]  }
  0x4f   :  { %1266 = vmatprep.subr.bf16.mxu0 %v1397_v6 }
  0x52   :  { %1267 = vmatpush3.bf16.msra.mxu0 %v1397_v6  ;;  %v1415_v6 = vld [vmem:[#allocation3 + $0x38] sm:$0xff]  }
  0x53   :  { %1268 = vmatprep.subr.bf16.mxu0 %v1398_v7 }
  0x56   :  { %1269 = vmatpush3.bf16.msra.mxu0 %v1398_v7  ;;  %v1422_v7 = vld [vmem:[#allocation9 + $0x8] sm:$0xff]  }
  0x57   :  { %1270 = vmatprep.subr.bf16.mxu0 %v1399_v8 }
  0x5a   :  { %1271 = vmatpush3.bf16.msra.mxu0 %v1399_v8  ;;  %v1423_v8 = vld [vmem:[#allocation9] sm:$0xff]  }
  0x5b   :  { %1320 = vmatprep.subr.bf16.mxu0 %v1416_v17 }
  0x5d   :  { %1273 = vmatmul.mubr.bf16.vlgmr.msra.gmra.mxu0 %v1401_v9  ;;  %v1424_v9 = vld [vmem:[#allocation11 + $0x38] sm:$0xff]  }
  0x5e   :  { %1276 = vmatprep.mubr.bf16.mxu0 %v1402_v10  ;;  %1321 = vmatpush3.bf16.msra.mxu0 %v1416_v17  ;;  %v1425_v10 = vld [vmem:[#allocation11 + $0x30] sm:$0xff]  }
  0x5f   :  { %1322 = vmatprep.subr.bf16.mxu0 %v1417_v18 }
  0x62   :  { %1323 = vmatpush3.bf16.msra.mxu0 %v1417_v18 }
  0x63   :  { %1324 = vmatprep.subr.bf16.mxu0 %v1418_v19 }
  0x65   :  { %1277 = vmatmul.mubr.bf16.gmra.mxu0 %v1403_v11  ;;  %v1426_v11 = vld [vmem:[#allocation11 + $0x28] sm:$0xff]  }
  0x66   :  { %1280 = vmatprep.mubr.bf16.mxu0 %v1404_v12  ;;  %1325 = vmatpush3.bf16.msra.mxu0 %v1418_v19  ;;  %v1427_v12 = vld [vmem:[#allocation11 + $0x20] sm:$0xff]  }
  0x67   :  { %1326 = vmatprep.subr.bf16.mxu0 %v1419_v20 }
  0x6a   :  { %1327 = vmatpush3.bf16.msra.mxu0 %v1419_v20 }
  0x6b   :  { %1328 = vmatprep.subr.bf16.mxu0 %v1420_v21 }
  0x6d   :  { %1281 = vmatmul.mubr.bf16.gmra.mxu0 %v1405_v13  ;;  %v1428_v13 = vld [vmem:[#allocation11 + $0x18] sm:$0xff]  }
  0x6e   :  { %1284 = vmatprep.mubr.bf16.mxu0 %v1406_v14  ;;  %1329 = vmatpush3.bf16.msra.mxu0 %v1420_v21 }
  0x6f   :  { %1330 = vmatprep.subr.bf16.mxu0 %v1421_v22 }
  0x72   :  { %1331 = vmatpush3.bf16.msra.mxu0 %v1421_v22 }
  0x73   :  { %1332 = vmatprep.subr.bf16.mxu0 %v1422_v7 }
  0x75   :  { %1285 = vmatmul.mubr.bf16.gmra.mxu0 %v1407_v15 }
  0x76   :  { %1333 = vmatpush3.bf16.msra.mxu0 %v1422_v7 }
  0x77   :  { %1334 = vmatprep.subr.bf16.mxu0 %v1423_v8 }
  0x7a   :  { %1335 = vmatpush3.bf16.msra.mxu0 %v1423_v8 }
 0x11d   :  { %v1274_v23 = vpop.f32.mrf.mxu0 }
 0x11e   :  { %v297_v59 = vadd.f32 %v1274_v23, %v1070_v37 }
 0x11f   :  { %v288_v24 = vpop.f32.mrf.mxu0 }
 0x120   :  { %v289_v62 = vadd.f32 %v1070_v37, %v288_v24 }
 0x121   :  { %v1275_v25 = vpop.f32.mrf.mxu0 }
 0x122   :  { %v300_v57 = vadd.f32 %v1275_v25, %v1070_v37 }
 0x123   :  { %v291_v26 = vpop.f32.mrf.mxu0 }
 0x124   :  { %v384_v60 = vpack.c.bf16 %v300_v57, %v297_v59  ;;  %v292_v61 = vadd.f32 %v1070_v37, %v291_v26 }
 0x125   :  { %v1278_v27 = vpop.f32.mrf.mxu0 }
 0x126   :  { %v313_v53 = vadd.f32 %v1278_v27, %v1070_v37  ;;  %v383_v63 = vpack.c.bf16 %v292_v61, %v289_v62 }
 0x127   :  { %v304_v28 = vpop.f32.mrf.mxu0 }
 0x128   :  { %v305_v56 = vadd.f32 %v1070_v37, %v304_v28 }
 0x129   :  { %v1279_v29 = vpop.f32.mrf.mxu0 }
 0x12a   :  { %v316_v51 = vadd.f32 %v1279_v29, %v1070_v37 }
 0x12b   :  { %v307_v30 = vpop.f32.mrf.mxu0 }
 0x12c   :  { %v386_v54 = vpack.c.bf16 %v316_v51, %v313_v53  ;;  %v308_v55 = vadd.f32 %v1070_v37, %v307_v30 }
 0x12d   :  { %v1282_v31 = vpop.f32.mrf.mxu0 }
 0x12e   :  { %v329_v47 = vadd.f32 %v1282_v31, %v1070_v37  ;;  %v385_v58 = vpack.c.bf16 %v308_v55, %v305_v56 }
 0x12f   :  { %v320_v32 = vpop.f32.mrf.mxu0 }
 0x130   :  { %v321_v50 = vadd.f32 %v1070_v37, %v320_v32 }
 0x131   :  { %v1283_v33 = vpop.f32.mrf.mxu0 }
 0x132   :  { %v332_v45 = vadd.f32 %v1283_v33, %v1070_v37 }
 0x133   :  { %v323_v34 = vpop.f32.mrf.mxu0 }
 0x134   :  { %v388_v48 = vpack.c.bf16 %v332_v45, %v329_v47  ;;  %v324_v49 = vadd.f32 %v1070_v37, %v323_v34 }
 0x135   :  { %v1286_v35 = vpop.f32.mrf.mxu0 }
 0x136   :  { %v345_v39 = vadd.f32 %v1286_v35, %v1070_v37  ;;  %v387_v52 = vpack.c.bf16 %v324_v49, %v321_v50 }
 0x137   :  { %v336_v36 = vpop.f32.mrf.mxu0 }
 0x138   :  { %v337_v42 = vadd.f32 %v1070_v37, %v336_v36 }
 0x139   :  { %v1287_v38 = vpop.f32.mrf.mxu0 }
 0x13a   :  { %v348_v40 = vadd.f32 %v1287_v38, %v1070_v37  ;;  %v1429_v38 = vld [vmem:[#allocation11 + $0x10] sm:$0xff]  }
 0x13b   :  { %v339_v41 = vpop.f32.mrf.mxu0 }
 0x13c   :  { %v340_v43 = vadd.f32 %v1070_v37, %v339_v41  ;;  %v390_v44 = vpack.c.bf16 %v348_v40, %v345_v39  ;;  %v1430_v39 = vld [vmem:[#allocation11 + $0x8] sm:$0xff]   ;;  %v1431_v40 = vld [vmem:[#allocation11] sm:$0xff]  }
 0x13e   :  { %v389_v46 = vpack.c.bf16 %v340_v43, %v337_v42  ;;  %1288 = vmatprep.subr.bf16.mxu1 %v390_v44  ;;  %v1095_v43 = vld [vmem:[%s1663_s5] ss:$0 sm:$0xff] }
 0x13f   :  { %1289 = vmatpush3.bf16.msra.mxu1 %v390_v44 }
 0x140   :  { %1290 = vmatprep.subr.bf16.mxu1 %v389_v46 }
 0x143   :  { %1291 = vmatpush3.bf16.msra.mxu1 %v389_v46 }
 0x144   :  { %1292 = vmatprep.subr.bf16.mxu1 %v388_v48 }
 0x147   :  { %1293 = vmatpush3.bf16.msra.mxu1 %v388_v48 }
 0x148   :  { %1294 = vmatprep.subr.bf16.mxu1 %v387_v52 }
 0x14b   :  { %1295 = vmatpush3.bf16.msra.mxu1 %v387_v52 }
 0x14c   :  { %1296 = vmatprep.subr.bf16.mxu1 %v386_v54 }
 0x14f   :  { %1297 = vmatpush3.bf16.msra.mxu1 %v386_v54 }
 0x150   :  { %1298 = vmatprep.subr.bf16.mxu1 %v385_v58 }
 0x153   :  { %1299 = vmatpush3.bf16.msra.mxu1 %v385_v58 }
 0x154   :  { %1300 = vmatprep.subr.bf16.mxu1 %v384_v60 }
 0x157   :  { %1301 = vmatpush3.bf16.msra.mxu1 %v384_v60 }
 0x158   :  { %1302 = vmatprep.subr.bf16.mxu1 %v383_v63 }
 0x15b   :  { %1303 = vmatpush3.bf16.msra.mxu1 %v383_v63 }
 0x15c   :  { %1352 = vmatprep.subr.bf16.mxu1 %v1424_v9 }
 0x15e   :  { %1305 = vmatmul.mubr.bf16.vlgmr.msra.gmra.mxu1 %v1409_v0 }
 0x15f   :  { %1308 = vmatprep.mubr.bf16.mxu1 %v1410_v1  ;;  %1353 = vmatpush3.bf16.msra.mxu1 %v1424_v9 }
 0x160   :  { %1354 = vmatprep.subr.bf16.mxu1 %v1425_v10 }
 0x163   :  { %1355 = vmatpush3.bf16.msra.mxu1 %v1425_v10 }
 0x164   :  { %1356 = vmatprep.subr.bf16.mxu1 %v1426_v11 }
 0x166   :  { %1309 = vmatmul.mubr.bf16.gmra.mxu1 %v1411_v2 }
 0x167   :  { %1312 = vmatprep.mubr.bf16.mxu1 %v1412_v3  ;;  %1357 = vmatpush3.bf16.msra.mxu1 %v1426_v11 }
 0x168   :  { %1358 = vmatprep.subr.bf16.mxu1 %v1427_v12 }
 0x16b   :  { %1359 = vmatpush3.bf16.msra.mxu1 %v1427_v12 }
 0x16c   :  { %1360 = vmatprep.subr.bf16.mxu1 %v1428_v13 }
 0x16e   :  { %1313 = vmatmul.mubr.bf16.gmra.mxu1 %v1413_v4 }
 0x16f   :  { %1316 = vmatprep.mubr.bf16.mxu1 %v1414_v5  ;;  %1361 = vmatpush3.bf16.msra.mxu1 %v1428_v13 }
 0x170   :  { %1362 = vmatprep.subr.bf16.mxu1 %v1429_v38 }
 0x173   :  { %1363 = vmatpush3.bf16.msra.mxu1 %v1429_v38 }
 0x174   :  { %1364 = vmatprep.subr.bf16.mxu1 %v1430_v39 }
 0x176   :  { %1317 = vmatmul.mubr.bf16.gmra.mxu1 %v1415_v6 }
 0x177   :  { %1365 = vmatpush3.bf16.msra.mxu1 %v1430_v39 }
 0x178   :  { %1366 = vmatprep.subr.bf16.mxu1 %v1431_v40 }
 0x17b   :  { %1367 = vmatpush3.bf16.msra.mxu1 %v1431_v40 }
 0x21e   :  { %v1306_v14 = vpop.f32.mrf.mxu1 }
 0x220   :  { %v473_v15 = vpop.f32.mrf.mxu1 }
 0x222   :  { %v1307_v16 = vpop.f32.mrf.mxu1 }
 0x223   :  { %v588_v19 = vpack.c.bf16 %v1307_v16, %v1306_v14 }
 0x224   :  { %v476_v17 = vpop.f32.mrf.mxu1 }
 0x225   :  { %v587_v18 = vpack.c.bf16 %v476_v17, %v473_v15 }
 0x226   :  { %v1310_v20 = vpop.f32.mrf.mxu1 }
 0x227   :  { %1336 = vmatprep.mubr.bf16.mxu0 %v587_v18 }
 0x228   :  { %v489_v21 = vpop.f32.mrf.mxu1  ;;  %1337 = vmatmul.mubr.bf16.vlgmr.msra.gmra.mxu0 %v588_v19 }
 0x22a   :  { %v1311_v22 = vpop.f32.mrf.mxu1 }
 0x22b   :  { %v590_v25 = vpack.c.bf16 %v1311_v22, %v1310_v20 }
 0x22c   :  { %v492_v23 = vpop.f32.mrf.mxu1 }
 0x22d   :  { %v589_v24 = vpack.c.bf16 %v492_v23, %v489_v21 }
 0x22e   :  { %v1314_v26 = vpop.f32.mrf.mxu1 }
 0x22f   :  { %1340 = vmatprep.mubr.bf16.mxu0 %v589_v24 }
 0x230   :  { %v505_v27 = vpop.f32.mrf.mxu1  ;;  %1341 = vmatmul.mubr.bf16.gmra.mxu0 %v590_v25 }
 0x232   :  { %v1315_v28 = vpop.f32.mrf.mxu1 }
 0x233   :  { %v592_v31 = vpack.c.bf16 %v1315_v28, %v1314_v26 }
 0x234   :  { %v508_v29 = vpop.f32.mrf.mxu1 }
 0x235   :  { %v591_v30 = vpack.c.bf16 %v508_v29, %v505_v27 }
 0x236   :  { %v1318_v32 = vpop.f32.mrf.mxu1 }
 0x237   :  { %1344 = vmatprep.mubr.bf16.mxu0 %v591_v30 }
 0x238   :  { %v521_v33 = vpop.f32.mrf.mxu1  ;;  %1345 = vmatmul.mubr.bf16.gmra.mxu0 %v592_v31 }
 0x23a   :  { %v1319_v34 = vpop.f32.mrf.mxu1 }
 0x23b   :  { %v594_v37 = vpack.c.bf16 %v1319_v34, %v1318_v32 }
 0x23c   :  { %v524_v35 = vpop.f32.mrf.mxu1 }
 0x23d   :  { %v593_v36 = vpack.c.bf16 %v524_v35, %v521_v33  ;;  %v1104_v35 = vld [vmem:[%s1665_s7] ss:$0 sm:$0xff]  ;;  %s1567_s7 = smov [#allocation12]  }
 0x23e   :  { %s1056_s9 = sshll.u32 %s1567_s7, 4  ;;  %s1057_s9 = int_to_ptr.vmem [resolvable:$true] %s1056_s9 }
 0x23f   :  { %1348 = vmatprep.mubr.bf16.mxu0 %v593_v36  ;;  %s1532_s12 = scalar_lea.vmem %s1057_s9, 1024  ;;  %p1537_p12 = scmp.lt.s32.totalorder %s1057_s9, %s1057_s9 }
 0x240   :  { %1349 = vmatmul.mubr.bf16.gmra.mxu0 %v594_v37  ;;  %p1533_p11 = scmp.ne.s32.totalorder %s1057_s9, %s1532_s12  ;;  %p1538_p13 = scmp.lt.s32.totalorder %s1532_s12, %s1532_s12 }
 0x242   :  { %p1539_p0 = por %p1538_p13, %p1537_p12 }
 0x244   :  { %p1540_p1 = pnand %p1539_p0, %p1533_p11 }
 0x2e8   :  { %v1338_v41 = vpop.f32.mrf.mxu0 }
 0x2e9   :  { %v709_v47 = vadd.f32 %v1338_v41, %v1095_v43 }
 0x2ea   :  { %v700_v42 = vpop.f32.mrf.mxu0 }
 0x2eb   :  { %v701_v45 = vadd.f32 %v1095_v43, %v700_v42  ;;  %v765_v54 = vmax.f32 %v709_v47, 0.0 }
 0x2ec   :  { %v1339_v44 = vpop.f32.mrf.mxu0 }
 0x2ed   :  { %v712_v46 = vadd.f32 %v1339_v44, %v1095_v43  ;;  %v763_v52 = vmax.f32 %v701_v45, 0.0 }
 0x2ee   :  { %v703_v48 = vpop.f32.mrf.mxu0 }
 0x2ef   :  { %v704_v49 = vadd.f32 %v1095_v43, %v703_v48  ;;  %v766_v50 = vmax.f32 %v712_v46, 0.0 }
 0x2f0   :  { %v1342_v51 = vpop.f32.mrf.mxu0 }
 0x2f1   :  { %v764_v53 = vmax.f32 %v704_v49, 0.0  ;;  %v780_v57 = vpack.c.bf16 %v766_v50, %v765_v54  ;;  %v725_v61 = vadd.f32 %v1342_v51, %v1095_v43 }
 0x2f2   :  { %v716_v55 = vpop.f32.mrf.mxu0 }
 0x2f3   :  { %v779_v56 = vpack.c.bf16 %v764_v53, %v763_v52  ;;  %v717_v59 = vadd.f32 %v1095_v43, %v716_v55  ;;  %v769_v4 = vmax.f32 %v725_v61, 0.0 }
 0x2f4   :  { %v1343_v58 = vpop.f32.mrf.mxu0 }
 0x2f5   :  { %v728_v60 = vadd.f32 %v1343_v58, %v1095_v43  ;;  %1368 = vmatprep.mubr.bf16.mxu1 %v779_v56  ;;  %v767_v2 = vmax.f32 %v717_v59, 0.0 }
 0x2f6   :  { %v719_v62 = vpop.f32.mrf.mxu0  ;;  %1369 = vmatmul.mubr.bf16.vlgmr.msra.gmra.mxu1 %v780_v57 }
 0x2f7   :  { %v720_v63 = vadd.f32 %v1095_v43, %v719_v62  ;;  %v770_v0 = vmax.f32 %v728_v60, 0.0 }
 0x2f8   :  { %v1346_v1 = vpop.f32.mrf.mxu0 }
 0x2f9   :  { %v768_v3 = vmax.f32 %v720_v63, 0.0  ;;  %v782_v7 = vpack.c.bf16 %v770_v0, %v769_v4  ;;  %v741_v11 = vadd.f32 %v1346_v1, %v1095_v43 }
 0x2fa   :  { %v732_v5 = vpop.f32.mrf.mxu0 }
 0x2fb   :  { %v781_v6 = vpack.c.bf16 %v768_v3, %v767_v2  ;;  %v733_v9 = vadd.f32 %v1095_v43, %v732_v5  ;;  %v773_v18 = vmax.f32 %v741_v11, 0.0 }
 0x2fc   :  { %v1347_v8 = vpop.f32.mrf.mxu0 }
 0x2fd   :  { %v744_v10 = vadd.f32 %v1347_v8, %v1095_v43  ;;  %1372 = vmatprep.mubr.bf16.mxu1 %v781_v6  ;;  %v771_v16 = vmax.f32 %v733_v9, 0.0 }
 0x2fe   :  { %v735_v12 = vpop.f32.mrf.mxu0  ;;  %1373 = vmatmul.mubr.bf16.gmra.mxu1 %v782_v7 }
 0x2ff   :  { %v736_v13 = vadd.f32 %v1095_v43, %v735_v12  ;;  %v774_v14 = vmax.f32 %v744_v10, 0.0 }
 0x300   :  { %v1350_v15 = vpop.f32.mrf.mxu0 }
 0x301   :  { %v772_v17 = vmax.f32 %v736_v13, 0.0  ;;  %v784_v21 = vpack.c.bf16 %v774_v14, %v773_v18  ;;  %v757_v25 = vadd.f32 %v1350_v15, %v1095_v43 }
 0x302   :  { %v748_v19 = vpop.f32.mrf.mxu0 }
 0x303   :  { %v783_v20 = vpack.c.bf16 %v772_v17, %v771_v16  ;;  %v749_v23 = vadd.f32 %v1095_v43, %v748_v19  ;;  %v777_v31 = vmax.f32 %v757_v25, 0.0 }
 0x304   :  { %v1351_v22 = vpop.f32.mrf.mxu0 }
 0x305   :  { %v760_v24 = vadd.f32 %v1351_v22, %v1095_v43  ;;  %1376 = vmatprep.mubr.bf16.mxu1 %v783_v20  ;;  %v775_v29 = vmax.f32 %v749_v23, 0.0 }
 0x306   :  { %v751_v26 = vpop.f32.mrf.mxu0  ;;  %1377 = vmatmul.mubr.bf16.gmra.mxu1 %v784_v21 }
 0x307   :  { %v752_v27 = vadd.f32 %v1095_v43, %v751_v26  ;;  %v778_v28 = vmax.f32 %v760_v24, 0.0 }
 0x309   :  { %v776_v30 = vmax.f32 %v752_v27, 0.0  ;;  %v786_v33 = vpack.c.bf16 %v778_v28, %v777_v31 }
 0x30b   :  { %v785_v32 = vpack.c.bf16 %v776_v30, %v775_v29 }
 0x30d   :  { %1380 = vmatprep.mubr.bf16.mxu1 %v785_v32 }
 0x30e   :  { %1381 = vmatmul.mubr.bf16.gmra.mxu1 %v786_v33 }
 0x3b6   :  { %v1370_v34 = vpop.f32.mrf.mxu1 }
 0x3b7   :  { %v901_v37 = vadd.f32 %v1370_v34, %v1104_v35 }
 0x3b8   :  { %v892_v36 = vpop.f32.mrf.mxu1 }
 0x3b9   :  { %v893_v39 = vadd.f32 %v1104_v35, %v892_v36  ;;  %v957_v42 = vmax.f32 %v901_v37, 0.0 }
 0x3ba   :  { %v1371_v38 = vpop.f32.mrf.mxu1 }
 0x3bb   :  { %v904_v40 = vadd.f32 %v1371_v38, %v1104_v35  ;;  %v955_v46 = vmax.f32 %v893_v39, 0.0 }
 0x3bc   :  { %v895_v41 = vpop.f32.mrf.mxu1 }
 0x3bd   :  { %v958_v43 = vmax.f32 %v904_v40, 0.0  ;;  %v896_v44 = vadd.f32 %v1104_v35, %v895_v41 }
 0x3be   :  { %v1374_v45 = vpop.f32.mrf.mxu1 }
 0x3bf   :  { %v1153_v47 = vpack.c.bf16 %v958_v43, %v957_v42  ;;  %v956_v48 = vmax.f32 %v896_v44, 0.0  ;;  %v917_v51 = vadd.f32 %v1374_v45, %v1104_v35 }
 0x3c0   :  { %v908_v49 = vpop.f32.mrf.mxu1 }
 0x3c1   :  { %1185 = vst [vmem:[#allocation12 + $0x8] sm:$0xff] %v1153_v47   ;;  %v1148_v50 = vpack.c.bf16 %v956_v48, %v955_v46  ;;  %v909_v53 = vadd.f32 %v1104_v35, %v908_v49  ;;  %v961_v56 = vmax.f32 %v917_v51, 0.0 }
 0x3c2   :  { %v1375_v52 = vpop.f32.mrf.mxu1 }
 0x3c3   :  { %1149 = vst [vmem:[#allocation12] sm:$0xff] %v1148_v50   ;;  %v920_v54 = vadd.f32 %v1375_v52, %v1104_v35  ;;  %v959_v60 = vmax.f32 %v909_v53, 0.0 }
 0x3c4   :  { %v911_v55 = vpop.f32.mrf.mxu1 }
 0x3c5   :  { %v962_v57 = vmax.f32 %v920_v54, 0.0  ;;  %v912_v58 = vadd.f32 %v1104_v35, %v911_v55 }
 0x3c6   :  { %v1378_v59 = vpop.f32.mrf.mxu1 }
 0x3c7   :  { %v1163_v61 = vpack.c.bf16 %v962_v57, %v961_v56  ;;  %v960_v62 = vmax.f32 %v912_v58, 0.0  ;;  %v933_v1 = vadd.f32 %v1378_v59, %v1104_v35 }
 0x3c8   :  { %v924_v63 = vpop.f32.mrf.mxu1 }
 0x3c9   :  { %1187 = vst [vmem:[#allocation12 + $0x18] sm:$0xff] %v1163_v61   ;;  %v1158_v0 = vpack.c.bf16 %v960_v62, %v959_v60  ;;  %v925_v3 = vadd.f32 %v1104_v35, %v924_v63  ;;  %v965_v6 = vmax.f32 %v933_v1, 0.0 }
 0x3ca   :  { %v1379_v2 = vpop.f32.mrf.mxu1 }
 0x3cb   :  { %1186 = vst [vmem:[#allocation12 + $0x10] sm:$0xff] %v1158_v0   ;;  %v936_v4 = vadd.f32 %v1379_v2, %v1104_v35  ;;  %v963_v10 = vmax.f32 %v925_v3, 0.0 }
 0x3cc   :  { %v927_v5 = vpop.f32.mrf.mxu1 }
 0x3cd   :  { %v966_v7 = vmax.f32 %v936_v4, 0.0  ;;  %v928_v8 = vadd.f32 %v1104_v35, %v927_v5 }
 0x3ce   :  { %v1382_v9 = vpop.f32.mrf.mxu1 }
 0x3cf   :  { %v1173_v11 = vpack.c.bf16 %v966_v7, %v965_v6  ;;  %v964_v12 = vmax.f32 %v928_v8, 0.0  ;;  %v949_v15 = vadd.f32 %v1382_v9, %v1104_v35 }
 0x3d0   :  { %v940_v13 = vpop.f32.mrf.mxu1 }
 0x3d1   :  { %1189 = vst [vmem:[#allocation12 + $0x28] sm:$0xff] %v1173_v11   ;;  %v1168_v14 = vpack.c.bf16 %v964_v12, %v963_v10  ;;  %v941_v17 = vadd.f32 %v1104_v35, %v940_v13  ;;  %v969_v20 = vmax.f32 %v949_v15, 0.0 }
 0x3d2   :  { %v1383_v16 = vpop.f32.mrf.mxu1 }
 0x3d3   :  { %1188 = vst [vmem:[#allocation12 + $0x20] sm:$0xff] %v1168_v14   ;;  %v952_v18 = vadd.f32 %v1383_v16, %v1104_v35  ;;  %v967_v23 = vmax.f32 %v941_v17, 0.0 }
 0x3d4   :  { %v943_v19 = vpop.f32.mrf.mxu1 }
 0x3d5   :  { %v970_v21 = vmax.f32 %v952_v18, 0.0  ;;  %v944_v22 = vadd.f32 %v1104_v35, %v943_v19 }
 0x3d7   :  { %v1183_v24 = vpack.c.bf16 %v970_v21, %v969_v20  ;;  %v968_v25 = vmax.f32 %v944_v22, 0.0 }
 0x3d9   :  { %1191 = vst [vmem:[#allocation12 + $0x38] sm:$0xff] %v1183_v24   ;;  %v1178_v26 = vpack.c.bf16 %v968_v25, %v967_v23 }
 0x3db   :  { %1190 = vst [vmem:[#allocation12 + $0x30] sm:$0xff] %v1178_v26  }
 0x3dc   :  { %1543 = shalt.err (!%p1540_p1)
}
 0x3dd   :  { %1062 = dma.vmem_to_hbm [thread:$0]  %s1057_s9, 1024, %s1666_s8, [#allocation5], %s1562_s10, %s1562_s10, %s1563_s11  }
 0x3de   :  { %1558 = dma.done.wait [#allocation5], 1024  }
 0x3df   :  { %1559 = vsyncadd [#allocation5], 4294966272 }
 0x3e0   :  { %1066 = vsyncpa [#allocation4], 1 }
 0x3e1   :  { %1067 = vsyncpa [#allocation7], 1 }
 0x3e2   :  { %1068 = vsyncpa [#allocation10], 1 }
 0x3e3   :  { %1069 = vsyncpa [#allocation5], 1 }

</bundles_post_ra>
